<compile_context>
chip_gen: v6e
topology: v6e:2x2x1
jax: 0.10.0
libtpu: 0.0.40
codegen_flags: <defaults>
</compile_context>

<pallas_src>
import math

import jax
import jax.numpy as jnp
from jax import lax
from jax.experimental import pallas as pl
from jax.experimental.pallas import tpu as pltpu


def _round_up(x, m):
    return (x + m - 1) // m * m


def _pick_tn(hwp, n_batch, tn_cap):
    """Largest multiple of 128 that divides hwp, <= tn_cap, keeping >=2 grid steps."""
    # Keep at least 2 total grid steps so v7x's two TensorCores both run.
    if n_batch == 1 and hwp >= 256:
        tn_cap = min(tn_cap, hwp // 2)
    best = 128
    for k in range(1, hwp // 128 + 1):
        tn = 128 * k
        if tn > tn_cap:
            break
        if hwp % tn == 0:
            best = tn
    return best


def _conv1x1_kernel(x_ref, w_ref, b_ref, o_ref):
    """x:(Cin,TN)  w:(Cout,Cin)  b:(Cout,1)  o:(Cout,TN)."""
    o_ref[...] = (
        jnp.dot(w_ref[...], x_ref[...],
                preferred_element_type=jnp.float32,
                precision=lax.Precision.HIGHEST)
        + b_ref[...]
    )


def conv1x1_nchw(x_nchw, w, b, *, tn=2048):
    """OutConv: 1x1 conv in NCHW.  x: (N,Cin,H,W) f32.  w: (Cout,Cin,1,1).  b: (Cout,)."""
    N, Cin, H, W = x_nchw.shape
    Cout = w.shape[0]
    HW = H * W

    HWp = _round_up(HW, 128)                      # lane-aligned spatial extent
    TN = _pick_tn(HWp, N, tn)                     # lanes per grid step

    xm = x_nchw.reshape(N, Cin, HW).astype(jnp.float32)
    if HWp != HW:                                 # only pads when HW % 128 != 0
        xm = jnp.pad(xm, ((0, 0), (0, 0), (0, HWp - HW)))
    wk = w.reshape(Cout, Cin).astype(jnp.float32)             # (Cout, Cin)
    bk = b.astype(jnp.float32).reshape(Cout, 1)               # (Cout, 1)

    cost = pl.CostEstimate(
        flops=2 * N * Cout * Cin * HWp,
        transcendentals=0,
        bytes_accessed=4 * (N * Cin * HWp + Cout * Cin + Cout + N * Cout * HWp),
    )

    out = pl.pallas_call(
        _conv1x1_kernel,
        out_shape=jax.ShapeDtypeStruct((N, Cout, HWp), jnp.float32),
        grid_spec=pltpu.PrefetchScalarGridSpec(
            num_scalar_prefetch=0,
            grid=(N, HWp // TN),
            in_specs=[
                pl.BlockSpec((None, Cin, TN), lambda n, j: (n, 0, j)),
                pl.BlockSpec((Cout, Cin), lambda n, j: (0, 0)),
                pl.BlockSpec((Cout, 1), lambda n, j: (0, 0)),
            ],
            out_specs=pl.BlockSpec((None, Cout, TN), lambda n, j: (n, 0, j)),
        ),
        compiler_params=pltpu.CompilerParams(
            dimension_semantics=("parallel", "parallel"),
        ),
        cost_estimate=cost,
    )(xm, wk, bk)

    if HWp != HW:
        out = out[:, :, :HW]
    return out.reshape(N, Cout, H, W)


def out_conv_forward(params, x_nchw):
    """PyTorch OutConv.forward: y = Conv2d(in_ch, out_ch, kernel_size=1)(x)."""
    return conv1x1_nchw(x_nchw.astype(jnp.float32), params["w"], params["b"])


def init_out_conv(key, in_ch, out_ch):
    """Deterministic PyTorch-style Conv2d(k=1) init."""
    kw, kb = jax.random.split(key)
    bound = 1.0 / math.sqrt(in_ch * 1 * 1)
    w = jax.random.uniform(kw, (out_ch, in_ch, 1, 1), jnp.float32, -bound, bound)
    b = jax.random.uniform(kb, (out_ch,), jnp.float32, -bound, bound)
    return dict(w=w, b=b)


if __name__ == "__main__":
    in_ch, out_ch = 4, 3
    N, H, W = 2, 16, 16          # HW = 256 -> TN = 256, grid = (2, 1): 2 parallel steps

    key = jax.random.PRNGKey(0)
    k_params, k_x = jax.random.split(key)
    params = init_out_conv(k_params, in_ch, out_ch)
    x = jax.random.normal(k_x, (N, in_ch, H, W), jnp.float32)

    fwd = jax.jit(out_conv_forward)
    out = fwd(params, x)
    jax.block_until_ready(out)

    assert out.shape == (N, out_ch, H, W), out.shape
    assert bool(jnp.all(jnp.isfinite(out)))

    # Plain-JAX reference for the 1x1 conv, at matching precision.
    ref = (jnp.einsum("nchw,oc->nohw", x, params["w"][:, :, 0, 0],
                      precision=lax.Precision.HIGHEST)
           + params["b"][None, :, None, None])
    assert bool(jnp.allclose(out, ref, atol=1e-5, rtol=1e-5)), (
        float(jnp.max(jnp.abs(out - ref))))

    print("KERNEL_OK")
</pallas_src>

<mosaic_0001>
module attributes {stable_mosaic.version = 11 : i64} {
  func.func @_conv1x1_kernel(%arg0: i32, %arg1: i32, %arg2: memref<1x4x256xf32, #tpu.memory_space<vmem>>, %arg3: memref<3x4xf32, #tpu.memory_space<vmem>>, %arg4: memref<3x1xf32, #tpu.memory_space<vmem>>, %arg5: memref<1x3x256xf32, #tpu.memory_space<vmem>>) attributes {dimension_semantics = [#tpu.dimension_semantics<parallel>, #tpu.dimension_semantics<parallel>], iteration_bounds = array<i64: 2, 1>, scalar_prefetch = 0 : i64, scratch_operands = 0 : i64, tpu.core_type = #tpu.core_type<tc>, window_params = [{transform_indices = @transform_0, window_bounds = array<i64: 1, 4, 256>}, {pipeline_mode = #tpu.pipeline_mode<synchronous>, transform_indices = @transform_1, window_bounds = array<i64: 3, 4>}, {pipeline_mode = #tpu.pipeline_mode<synchronous>, transform_indices = @transform_2, window_bounds = array<i64: 3, 1>}, {transform_indices = @transform_3, window_bounds = array<i64: 1, 3, 256>}]} {
    %c0 = arith.constant 0 : index
    %c0_0 = arith.constant 0 : index
    %0 = vector.load %arg3[%c0, %c0_0] : memref<3x4xf32, #tpu.memory_space<vmem>>, vector<3x4xf32>
    %c0_1 = arith.constant 0 : index
    %c0_2 = arith.constant 0 : index
    %c0_3 = arith.constant 0 : index
    %1 = vector.load %arg2[%c0_1, %c0_2, %c0_3] : memref<1x4x256xf32, #tpu.memory_space<vmem>>, vector<1x4x256xf32>
    %2 = vector.shape_cast %1 : vector<1x4x256xf32> to vector<4x256xf32>
    %cst = arith.constant dense<0.000000e+00> : vector<3x256xf32>
    %3 = tpu.matmul %0, %2, %cst {dimension_numbers = #tpu.dot_dimension_numbers<[1], [0], [0], [1], [0, 0, 1, 1], [], []>, precision = #tpu.contract_precision<fp32>} : vector<3x4xf32>, vector<4x256xf32>, vector<3x256xf32> -> vector<3x256xf32>
    %c0_4 = arith.constant 0 : index
    %c0_5 = arith.constant 0 : index
    %4 = vector.load %arg4[%c0_4, %c0_5] : memref<3x1xf32, #tpu.memory_space<vmem>>, vector<3x1xf32>
    %5 = vector.broadcast %4 : vector<3x1xf32> to vector<3x256xf32>
    %6 = arith.addf %3, %5 : vector<3x256xf32>
    %c0_6 = arith.constant 0 : index
    %c0_7 = arith.constant 0 : index
    %c0_8 = arith.constant 0 : index
    %7 = vector.load %arg5[%c0_6, %c0_7, %c0_8] : memref<1x3x256xf32, #tpu.memory_space<vmem>>, vector<1x3x256xf32>
    %8 = vector.shape_cast %7 : vector<1x3x256xf32> to vector<3x256xf32>
    %9 = vector.shape_cast %6 : vector<3x256xf32> to vector<1x3x256xf32>
    tpu.vector_store %arg5[%c0_6, %c0_7, %c0_8], %9 {strides = array<i32>} : memref<1x3x256xf32, #tpu.memory_space<vmem>>, vector<1x3x256xf32>,
    return
  }
  func.func @transform_0(%arg0: i32, %arg1: i32) -> (i32, i32, i32) {
    %c0_i32 = arith.constant 0 : i32
    %c0_i32_0 = arith.constant 0 : i32
    return %arg0, %c0_i32, %arg1 : i32, i32, i32
  }
  func.func @transform_1(%arg0: i32, %arg1: i32) -> (i32, i32) {
    %c0_i32 = arith.constant 0 : i32
    %c0_i32_0 = arith.constant 0 : i32
    %c0_i32_1 = arith.constant 0 : i32
    return %c0_i32, %c0_i32_0 : i32, i32
  }
  func.func @transform_2(%arg0: i32, %arg1: i32) -> (i32, i32) {
    %c0_i32 = arith.constant 0 : i32
    %c0_i32_0 = arith.constant 0 : i32
    %c0_i32_1 = arith.constant 0 : i32
    return %c0_i32, %c0_i32_0 : i32, i32
  }
  func.func @transform_3(%arg0: i32, %arg1: i32) -> (i32, i32, i32) {
    %c0_i32 = arith.constant 0 : i32
    %c0_i32_0 = arith.constant 0 : i32
    return %arg0, %c0_i32, %arg1 : i32, i32, i32
  }
}

</mosaic_0001>

<bundles_post_ra>
// kernel: out_conv_forward.1
= control target key start
LH: loop header
LB: loop body
LE: loop exit
PB: predicated region body
PF: predicated region fallthrough
CT: control target
= control target key end

     0   :  { %s873_s12 = smov 0   ;;  %s875_s13 = smov 0   ;;  %s919_s0 = inlined_call_operand.vmem [shape: f32[2,4,256], index: 0, kind: input, shape index: {}]   ;;  %s920_s1 = inlined_call_operand.vmem [shape: f32[3,4], index: 1, kind: input, shape index: {}]   ;;  %s921_s2 = inlined_call_operand.vmem [shape: f32[3,1], index: 2, kind: input, shape index: {}]   ;;  %s922_s3 = inlined_call_operand.vmem [shape: f32[2,3,256], index: 3, kind: output, shape index: {}]  }
   0x1   :  { %s877_s14 = smov 0  }
   0x2 LB: > { %s25_s15 = sadd.s32 1, %s845_s13  ;;  %p790_p0 = scmp.ge.s32.totalorder %s849_s14, 1  ;;  %s849_s14 = sphi %s877_s14, %s13_s14   ;;  %s845_s13 = sphi %s875_s13, %s924_s13   ;;  %s841_s12 = sphi %s873_s12, %s923_s12  }
   0x3   : > { %p27_p1 = scmp.ge.s32.totalorder %s25_s15, 2  ;;  %p158_p2 = scmp.lt.s32.totalorder %s849_s14, 3 }
   0x5   : > { %s926_s15 = smov (%p27_p1, %s25_s15), 0  ;;  %p159_p3 = pnand %p790_p0, %p158_p2 }
   0x6   : > { %p191_p4 = scmp.lt.s32.totalorder (!%p159_p3), %s841_s12, 1 }
   0x7   : > { %162 = sbr.rel (%p159_p3) target bundleno = 240 (0xf0), region = 32 }
   0xc   : > { %v210_v0 = vld [vmem:[%s920_s1] sm:$0x7]  ;;  %vm220_vm0 = vcmask 31744   ;;  %v851_v1 = vmov 0.0   ;;  %s928_s12 = smov (!%p191_p4, %s841_s12), 1  ;;  %v852_v5 = vmov 0  }
   0xd   : > { %295 = vmatprep.mubr.f32.mxu0 %v851_v1  ;;  %v222_v2 = vsel %vm220_vm0, %v210_v0, 0  ;;  %381 = vmatprep.mubr.f32.mxu1 %v851_v1  ;;  %v212_v3 = vld [vmem:[%s921_s2] sm:$0x7]  ;;  %s797_s20 = sshll.u32 %s928_s12, 3  ;;  %vm224_vm1 = vcmask 1043456  }
   0xe   : > { %v296_v4 = vand.u32 4294901760, %v222_v2  ;;  %825 = vset.pattern.permute.xlu0 %v852_v5  ;;  %s198_s23 = scalar_lea.vmem %s919_s0, %s797_s20  ;;  %s208_s26 = scalar_lea.vmem %s922_s3, %s797_s20 }
   0xf   : > { %215 = vperm.xlu0 %825, %v212_v3   ;;  %v211_v7 = vld [vmem:[%s198_s23] sm:$0xff] }
  0x10   : > { %v297_v6 = vsub.f32 %v222_v2, %v296_v4  ;;  %v219_v9 = vcombine.high %v211_v7, %v211_v7  ;;  %v225_v10 = vsel %vm224_vm1, %v211_v7, 0 }
  0x11   : > { %v261_v11 = vand.u32 4294901760, %v225_v10 }
  0x12   : > { %v298_v8 = vand.u32 4294901760, %v297_v6  ;;  %v227_v13 = vsel %vm224_vm1, %v219_v9, 0 }
  0x13   : > { %v259_v14 = vand.u32 4294901760, %v227_v13  ;;  %v344_v16 = vsub.f32 %v225_v10, %v261_v11 }
  0x14   : > { %v299_v12 = vsub.f32 %v297_v6, %v298_v8 }
  0x15   : > { %260 = vmatprep.subr.mxu0 %v259_v14  ;;  %v338_v17 = vsub.f32 %v227_v13, %v259_v14  ;;  %v345_v18 = vand.u32 4294901760, %v344_v16 }
  0x16   : > { %v300_v15 = vand.u32 4294901760, %v299_v12  ;;  %262 = vmatpush1.msra.mxu0 %v261_v11 }
  0x17   : > { %v339_v19 = vand.u32 4294901760, %v338_v17  ;;  %421 = vmatprep.subr.mxu0 %v338_v17  ;;  %v346_v20 = vsub.f32 %v344_v16, %v345_v18 }
  0x18   : > { %301 = vmatmul.mubr.f32.vlgmr.msra.gmra.mxu0 %v300_v15 }
  0x19   : > { %424 = vmatpush1.msra.mxu0 %v344_v16  ;;  %457 = vmatprep.mubr.f32.mxu0 %v851_v1  ;;  %v340_v21 = vsub.f32 %v338_v17, %v339_v19  ;;  %v347_v22 = vand.u32 4294901760, %v346_v20 }
  0x1a   : > { %575 = vmatprep.subr.mxu0 %v339_v19 }
  0x1b   : > { %v341_v23 = vand.u32 4294901760, %v340_v21 }
  0x1c   : > { %460 = vmatmul.mubr.f32.vlgmr.msra.gmra.mxu0 %v297_v6 }
  0x1d   : > { %579 = vmatpush1.msra.mxu0 %v345_v18  ;;  %612 = vmatprep.mubr.f32.mxu0 %v851_v1 }
  0x1e   : > { %342 = vmatprep.subr.mxu1 %v341_v23 }
  0x1f   : > { %348 = vmatpush1.msra.mxu1 %v347_v22 }
  0x20   : > { %383 = vmatmul.mubr.f32.vlgmr.msra.gmra.mxu1 %v296_v4  ;;  %497 = vmatprep.subr.mxu1 %v259_v14 }
  0x21   : > { %499 = vmatpush1.msra.mxu1 %v261_v11  ;;  %532 = vmatprep.mubr.f32.mxu1 %v851_v1 }
  0x22   : > { %651 = vmatprep.subr.mxu1 %v259_v14  ;;  %614 = vmatmul.mubr.f32.vlgmr.msra.gmra.mxu0 %v296_v4 }
  0x24   : > { %536 = vmatmul.mubr.f32.vlgmr.msra.gmra.mxu1 %v298_v8 }
  0x25   : > { %653 = vmatpush1.msra.mxu1 %v261_v11  ;;  %686 = vmatprep.mubr.f32.mxu1 %v851_v1 }
  0x28   : > { %688 = vmatmul.mubr.f32.vlgmr.msra.gmra.mxu1 %v296_v4 }
  0x8a   : > { %v216_v25 = vpop.permute.xlu0 %215 }
  0xd8   : > { %v302_v24 = vpop.f32.mrf.mxu0 }
  0xd9   : > { %v303_v28 = vadd.f32 %v302_v24, %v216_v25 }
  0xda   : > { %v304_v26 = vpop.f32.mrf.mxu0 }
  0xdb   : > { %v305_v31 = vadd.f32 %v304_v26, %v216_v25 }
  0xdc   : > { %v461_v27 = vpop.f32.mrf.mxu0 }
  0xde   : > { %v463_v30 = vpop.f32.mrf.mxu0 }
  0xe0   : > { %v384_v29 = vpop.f32.mrf.mxu1 }
  0xe1   : > { %v385_v32 = vadd.f32 %v384_v29, %v303_v28 }
  0xe2   : > { %v386_v33 = vpop.f32.mrf.mxu1  ;;  %v615_v37 = vpop.f32.mrf.mxu0 }
  0xe3   : > { %v462_v34 = vadd.f32 %v461_v27, %v385_v32  ;;  %v387_v35 = vadd.f32 %v386_v33, %v305_v31 }
  0xe4   : > { %v537_v36 = vpop.f32.mrf.mxu1  ;;  %v617_v43 = vpop.f32.mrf.mxu0 }
  0xe5   : > { %v464_v38 = vadd.f32 %v463_v30, %v387_v35  ;;  %v538_v39 = vadd.f32 %v537_v36, %v462_v34 }
  0xe6   : > { %v539_v40 = vpop.f32.mrf.mxu1 }
  0xe7   : > { %v616_v41 = vadd.f32 %v615_v37, %v538_v39  ;;  %v540_v42 = vadd.f32 %v539_v40, %v464_v38 }
  0xe8   : > { %v689_v44 = vpop.f32.mrf.mxu1 }
  0xe9   : > { %v618_v45 = vadd.f32 %v617_v43, %v540_v42  ;;  %v690_v47 = vadd.f32 %v689_v44, %v616_v41 }
  0xea   : > { %v691_v46 = vpop.f32.mrf.mxu1 }
  0xeb   : > { %v692_v48 = vadd.f32 %v691_v46, %v618_v45 }
  0xed   : > { %v696_v49 = vcombine.low %v690_v47, %v692_v48 }
  0xef   : > { %698 = vst [vmem:[%s208_s26] sm:$0x77] %v696_v49 }
  0xf0 PF: > { %s13_s14 = sadd.s32 1, %s849_s14   ;;  %s923_s12 = smov %s845_s13 }
  0xf1   : > { %p10_p5 = scmp.ge.s32.totalorder %s13_s14, 4   ;;  %s924_s13 = smov %s926_s15 }
  0xf3   :  { %12 = sbr.rel (!%p10_p5) target bundleno = 2 (0x2), region = 62 }

</bundles_post_ra>
